<compile_context>
chip_gen: v7x
topology: tpu7x:2x2x1
jax: 0.10.0
libtpu: 0.0.40
codegen_flags: <defaults>
</compile_context>

<pallas_src>
import functools

import jax
import jax.numpy as jnp
from jax.experimental import pallas as pl
from jax.experimental.pallas import tpu as pltpu


def _round_up(x, m):
    return ((x + m - 1) // m) * m


def _pick_tile(n_pad, target, min_count=1):
    """Largest multiple of 128 that divides n_pad, is <= target, and leaves at
    least `min_count` tiles.  Falls back to 128."""
    best = 128
    for t in range(128, min(target, n_pad) + 1, 128):
        if n_pad % t == 0 and n_pad // t >= min_count:
            best = t
    return best


def _agg_kernel(adj_ref, xw_ref, out_ref, *, tk, nout, xw_resident):
    """out[i-tile] = (sum_k adj[i-tile, k-tile] @ xw[k-tile]) * 1/rowsum.

    xw carries an all-ones column at lane `nout`, so the MXU produces
    rowsum(adj) in that lane of the accumulator for free.
    """
    k = pl.program_id(1)

    @pl.when(k == 0)
    def _init():
        out_ref[...] = jnp.zeros_like(out_ref)

    if xw_resident:
        # Full XW is VMEM-resident; slice the k-th contraction chunk.
        xw = xw_ref[pl.ds(pl.multiple_of(k * tk, 128), tk), :]
    else:
        xw = xw_ref[...]

    out_ref[...] += jnp.dot(adj_ref[...], xw, preferred_element_type=jnp.float32)

    @pl.when(k == pl.num_programs(1) - 1)
    def _finalize():
        acc = out_ref[...]
        # Lane `nout` of acc holds rowsum(adj) (ones column of xw).
        col = jax.lax.broadcasted_iota(jnp.int32, acc.shape, 1)
        rowsum = jnp.sum(jnp.where(col == nout, acc, 0.0), axis=1, keepdims=True)
        out_ref[...] = acc * pl.reciprocal(rowsum, approx=False)


def gcn_net_forward(adj, x, w, *, tm_target=512, tk_target=2048,
                    use_bf16=True, xw_resident_budget=16 << 20):
    """GCNNet.forward(A, X) with weight w of shape (nfeat, nout)."""
    n, n2 = adj.shape
    assert n == n2, "adjacency must be square"
    nfeat, nout = w.shape
    assert x.shape == (n, nfeat)

    # Pad the node dim only to a multiple of 128 (lane width), not the tile
    # size, so aligned N streams adj straight from HBM with zero extra passes.
    n_pad = _round_up(n, 128)
    # For large, awkward N a 128-multiple may only admit tiny tiles; padding a
    # bit further (one fused pad[+cast] pass) buys back far more in streaming
    # efficiency than the extra bytes cost.
    if n >= 2048 and _pick_tile(n_pad, tk_target) < 512:
        n_pad = _round_up(n, 512)
    needs_pad = n_pad != n

    # bf16 halves the dominant HBM stream, but only cast when fused into an
    # already-required pass (the pad) or when adj already arrives as bf16;
    # a standalone astype pass over N^2 costs more HBM than it saves.
    if use_bf16 and (needs_pad or adj.dtype == jnp.bfloat16):
        adj_dtype = jnp.bfloat16
    else:
        adj_dtype = adj.dtype

    if needs_pad or adj.dtype != adj_dtype:
        adj_in = jnp.pad(adj, ((0, n_pad - n), (0, n_pad - n))).astype(adj_dtype)
    else:
        adj_in = adj  # no copy: stream the caller's array directly

    # xw = X @ W is negligible; let XLA do it and build the lane-dense padded
    # operand.  Lane `nout` is the all-ones column for the MXU row-sum trick;
    # padded rows stay all-zero so padded adj columns contribute nothing.
    nout_p = _round_up(nout + 1, 128)
    xw = jnp.dot(x.astype(jnp.float32), w.astype(jnp.float32),
                 preferred_element_type=jnp.float32)
    xw = jnp.concatenate([xw, jnp.ones((n, 1), jnp.float32)], axis=1)
    xw_p = jnp.pad(xw, ((0, n_pad - n), (0, nout_p - (nout + 1)))).astype(adj_dtype)

    # Tile selection: large tiles to amortize per-grid-step overhead, but keep
    # >= 2 row tiles when possible so v7x can shard the parallel axis over
    # both TensorCores.
    tm = _pick_tile(n_pad, tm_target, min_count=2)
    tk = _pick_tile(n_pad, tk_target, min_count=1)

    itemsize = jnp.dtype(adj_dtype).itemsize
    xw_bytes = n_pad * nout_p * itemsize
    xw_resident = xw_bytes <= xw_resident_budget
    if xw_resident:
        xw_spec = pl.BlockSpec((n_pad, nout_p), lambda i, k: (0, 0))
        xw_vmem = 2 * xw_bytes
    else:
        xw_spec = pl.BlockSpec((tk, nout_p), lambda i, k: (k, 0))
        xw_vmem = 2 * tk * nout_p * itemsize

    # Double-buffered adj tiles + xw + double-buffered f32 output block.
    vmem_needed = 2 * tm * tk * itemsize + xw_vmem + 2 * tm * nout_p * 4
    vmem_limit = max(32 << 20, min(int(vmem_needed * 1.25) + (2 << 20), 100 << 20))

    kernel = functools.partial(_agg_kernel, tk=tk, nout=nout,
                               xw_resident=xw_resident)

    out_p = pl.pallas_call(
        kernel,
        out_shape=jax.ShapeDtypeStruct((n_pad, nout_p), jnp.float32),
        grid_spec=pltpu.PrefetchScalarGridSpec(
            num_scalar_prefetch=0,
            grid=(n_pad // tm, n_pad // tk),
            in_specs=[
                pl.BlockSpec((tm, tk), lambda i, k: (i, k)),
                xw_spec,
            ],
            out_specs=pl.BlockSpec((tm, nout_p), lambda i, k: (i, 0)),
        ),
        compiler_params=pltpu.CompilerParams(
            dimension_semantics=("parallel", "arbitrary"),
            vmem_limit_bytes=vmem_limit,
        ),
    )(adj_in, xw_p)

    return out_p[:n, :nout]


def reference_forward(adj, x, w):
    rowsum = jnp.sum(adj, axis=1, keepdims=True)
    return ((adj / rowsum) @ x) @ w


if __name__ == "__main__":
    key = jax.random.PRNGKey(0)

    # Case 1: N multiple of 128 -> adj streamed directly (f32, no extra pass).
    N, NFEAT, NOUT = 384, 32, 16
    k_adj, k_x, k_w = jax.random.split(key, 3)
    # Strictly positive adjacency so no zero rows (matches module assumption).
    adj = jax.random.uniform(k_adj, (N, N), dtype=jnp.float32) + 0.1
    x = jax.random.uniform(k_x, (N, NFEAT), dtype=jnp.float32)
    # GCN.__init__: W = torch.rand(in_dim, out_dim) -> uniform [0, 1).
    w = jax.random.uniform(k_w, (NFEAT, NOUT), dtype=jnp.float32)

    out = jax.block_until_ready(gcn_net_forward(adj, x, w))
    ref = reference_forward(adj, x, w)
    assert out.shape == (N, NOUT)
    assert jnp.allclose(out, ref, rtol=5e-3, atol=5e-3), "case1 mismatch vs reference"

    # Case 2: ragged N -> fused pad + bf16 cast path (single pass over adj).
    N2 = 200
    k_adj2, k_x2 = jax.random.split(k_adj)
    adj2 = jax.random.uniform(k_adj2, (N2, N2), dtype=jnp.float32) + 0.1
    x2 = jax.random.uniform(k_x2, (N2, NFEAT), dtype=jnp.float32)
    out2 = jax.block_until_ready(gcn_net_forward(adj2, x2, w, use_bf16=True))
    ref2 = reference_forward(adj2, x2, w)
    assert out2.shape == (N2, NOUT)
    assert jnp.allclose(out2, ref2, rtol=3e-2, atol=3e-2), "case2 mismatch vs reference"

    print("KERNEL_OK")
</pallas_src>

<mosaic_0001>
module attributes {stable_mosaic.version = 11 : i64} {
  func.func @_agg_kernel(%arg0: i32, %arg1: i32, %arg2: memref<128x384xf32, #tpu.memory_space<vmem>>, %arg3: memref<384x128xf32, #tpu.memory_space<vmem>>, %arg4: memref<128x128xf32, #tpu.memory_space<vmem>>) attributes {dimension_semantics = [#tpu.dimension_semantics<parallel>, #tpu.dimension_semantics<arbitrary>], iteration_bounds = array<i64: 3, 1>, scalar_prefetch = 0 : i64, scratch_operands = 0 : i64, tpu.core_type = #tpu.core_type<tc>, window_params = [{transform_indices = @transform_0, window_bounds = array<i64: 128, 384>}, {pipeline_mode = #tpu.pipeline_mode<synchronous>, transform_indices = @transform_1, window_bounds = array<i64: 384, 128>}, {transform_indices = @transform_2, window_bounds = array<i64: 128, 128>}]} {
    %c0_i32 = arith.constant 0 : i32
    %0 = arith.cmpi eq, %arg1, %c0_i32 : i32
    %1 = arith.extui %0 : i1 to i32
    %c0_i32_0 = arith.constant 0 : i32
    %2 = arith.cmpi ne, %1, %c0_i32_0 : i32
    scf.if %2 {
      %cst_9 = arith.constant 0.000000e+00 : f32
      %15 = vector.broadcast %cst_9 : f32 to vector<128x128xf32>
      %c0_10 = arith.constant 0 : index
      %c0_11 = arith.constant 0 : index
      %16 = vector.load %arg4[%c0_10, %c0_11] : memref<128x128xf32, #tpu.memory_space<vmem>>, vector<128x128xf32>
      tpu.vector_store %arg4[%c0_10, %c0_11], %15 {strides = array<i32>} : memref<128x128xf32, #tpu.memory_space<vmem>>, vector<128x128xf32>,
    } else {
    }
    %c384_i32 = arith.constant 384 : i32
    %3 = arith.muli %arg1, %c384_i32 : i32
    %4 = tpu.assume_multiple %3, 128 : i32
    %5 = arith.index_cast %4 : i32 to index
    %c0 = arith.constant 0 : index
    %6 = vector.load %arg3[%5, %c0] : memref<384x128xf32, #tpu.memory_space<vmem>>, vector<384x128xf32>
    %c0_1 = arith.constant 0 : index
    %c0_2 = arith.constant 0 : index
    %7 = vector.load %arg4[%c0_1, %c0_2] : memref<128x128xf32, #tpu.memory_space<vmem>>, vector<128x128xf32>
    %c0_3 = arith.constant 0 : index
    %c0_4 = arith.constant 0 : index
    %8 = vector.load %arg2[%c0_3, %c0_4] : memref<128x384xf32, #tpu.memory_space<vmem>>, vector<128x384xf32>
    %cst = arith.constant dense<0.000000e+00> : vector<128x128xf32>
    %9 = tpu.matmul %8, %6, %cst {dimension_numbers = #tpu.dot_dimension_numbers<[1], [0], [0], [1], [0, 0, 1, 1], [], []>} : vector<128x384xf32>, vector<384x128xf32>, vector<128x128xf32> -> vector<128x128xf32>
    %10 = arith.addf %7, %9 : vector<128x128xf32>
    %c0_5 = arith.constant 0 : index
    %c0_6 = arith.constant 0 : index
    %11 = vector.load %arg4[%c0_5, %c0_6] : memref<128x128xf32, #tpu.memory_space<vmem>>, vector<128x128xf32>
    tpu.vector_store %arg4[%c0_5, %c0_6], %10 {strides = array<i32>} : memref<128x128xf32, #tpu.memory_space<vmem>>, vector<128x128xf32>,
    %c0_i32_7 = arith.constant 0 : i32
    %12 = arith.cmpi eq, %arg1, %c0_i32_7 : i32
    %13 = arith.extui %12 : i1 to i32
    %c0_i32_8 = arith.constant 0 : i32
    %14 = arith.cmpi ne, %13, %c0_i32_8 : i32
    scf.if %14 {
      %c0_9 = arith.constant 0 : index
      %c0_10 = arith.constant 0 : index
      %15 = vector.load %arg4[%c0_9, %c0_10] : memref<128x128xf32, #tpu.memory_space<vmem>>, vector<128x128xf32>
      %16 = tpu.iota {dimensions = array<i32: 1>} : vector<128x128xi32>
      %c16_i32 = arith.constant 16 : i32
      %17 = vector.broadcast %c16_i32 : i32 to vector<128x128xi32>
      %18 = arith.cmpi eq, %16, %17 : vector<128x128xi32>
      %cst_11 = arith.constant 0.000000e+00 : f32
      %19 = vector.broadcast %cst_11 : f32 to vector<128x128xf32>
      %20 = arith.select %18, %15, %19 : vector<128x128xi1>, vector<128x128xf32>
      %cst_12 = arith.constant dense<0.000000e+00> : vector<128xf32>
      %21 = vector.multi_reduction <add>, %20, %cst_12 [1] : vector<128x128xf32> to vector<128xf32>
      %22 = vector.shape_cast %21 : vector<128xf32> to vector<128x1xf32>
      %23 = tpu.reciprocal %22 : vector<128x1xf32> -> vector<128x1xf32>
      %24 = vector.broadcast %23 : vector<128x1xf32> to vector<128x128xf32>
      %25 = arith.mulf %15, %24 : vector<128x128xf32>
      %c0_13 = arith.constant 0 : index
      %c0_14 = arith.constant 0 : index
      %26 = vector.load %arg4[%c0_13, %c0_14] : memref<128x128xf32, #tpu.memory_space<vmem>>, vector<128x128xf32>
      tpu.vector_store %arg4[%c0_13, %c0_14], %25 {strides = array<i32>} : memref<128x128xf32, #tpu.memory_space<vmem>>, vector<128x128xf32>,
    } else {
    }
    return
  }
  func.func @transform_0(%arg0: i32, %arg1: i32) -> (i32, i32) {
    %c0_i32 = arith.constant 0 : i32
    return %arg0, %arg1 : i32, i32
  }
  func.func @transform_1(%arg0: i32, %arg1: i32) -> (i32, i32) {
    %c0_i32 = arith.constant 0 : i32
    %c0_i32_0 = arith.constant 0 : i32
    %c0_i32_1 = arith.constant 0 : i32
    return %c0_i32, %c0_i32_0 : i32, i32
  }
  func.func @transform_2(%arg0: i32, %arg1: i32) -> (i32, i32) {
    %c0_i32 = arith.constant 0 : i32
    %c0_i32_0 = arith.constant 0 : i32
    return %arg0, %c0_i32 : i32, i32
  }
}

</mosaic_0001>

<bundles_post_ra>
// kernel: tpu_custom_call.1
= control target key start
LH: loop header
LB: loop body
LE: loop exit
PB: predicated region body
PF: predicated region fallthrough
CT: control target
= control target key end

     0   :  { %7 = vsyncpa [#allocation3], 0  ;;  %s1795_s0 = inlined_call_operand.hbm [shape: f32[384,384], index: 0, kind: input, shape index: {}]   ;;  %s1796_s1 = inlined_call_operand.hbm [shape: f32[384,128], index: 1, kind: input, shape index: {}]   ;;  %s1797_s2 = inlined_call_operand.hbm [shape: f32[384,128], index: 2, kind: output, shape index: {}]  }
   0x1   :  { %9 = vsyncpa [#allocation3 + $0x1], 0 }
   0x2   :  { %10 = vsyncpa [#allocation6], 0 }
   0x3   :  { %11 = vsyncpa [#allocation4], 0 }
   0x4   :  { %13 = vsyncpa [#allocation4 + $0x1], 0  ;;  %s1415_s9 = smov 0   ;;  %s1417_s10 = smov 0  }
   0x5   :  { %s1419_s11 = smov 0   ;;  %s1421_s12 = smov 0  }
   0x6   :  { %s1423_s13 = smov 0   ;;  %s1425_s14 = smov 0  }
   0x7 LB: > { %s881_s15 = sadd.s32 4294967295, %s1389_s14   ;;  %s882_s16 = sadd.s32 4294967294, %s1389_s14   ;;  %s1389_s14 = sphi %s1425_s14, %s19_s14   ;;  %s1385_s13 = sphi %s1423_s13, %s1819_s13   ;;  %s1381_s12 = sphi %s1421_s12, %s1818_s12   ;;  %s1377_s11 = sphi %s1419_s11, %s1817_s11   ;;  %s1373_s10 = sphi %s1417_s10, %s1816_s10   ;;  %s1369_s9 = sphi %s1415_s9, %s1815_s9  }
   0x8   : > { %p53_p0 = scmp.ne.s32.totalorder %s1373_s10, %s1369_s9  ;;  %p1449_p1 = scmp.eq.s32.totalorder %s881_s15, 0 }
   0x9   : > { %p1453_p2 = scmp.eq.s32.totalorder %s881_s15, 2  ;;  %p104_p3 = scmp.eq.s32.totalorder %s882_s16, 2 }
   0xa   : > { %s1802_s17 = scalar_select %p1449_p1, 1, 0 }
   0xb   : > { %s1803_s18 = scalar_select %p1453_p2, 1, 0 }
   0xc   : > { %p1459_p4 = por %p1449_p1, %p53_p0  ;;  %p883_p5 = scmp.ge.s32.totalorder %s1389_s14, 1 }
   0xd   : > { %p1464_p6 = por %p104_p3, %p53_p0  ;;  %p111_p7 = scmp.lt.s32.totalorder %s1389_s14, 4 }
   0xe   : > { %s1804_s19 = scalar_select %p1459_p4, 1, 0 }
   0xf   : > { %s1805_s20 = scalar_select %p1464_p6, 1, 0 }
  0x10   : > { %p1469_p8 = pnand %p883_p5, %p111_p7  ;;  %s1391_s22 = smov [#allocation5]  }
  0x11   : > { %s123_s23 = sshll.u32 %s1391_s22, 4  ;;  %s31_s25 = sadd.s32 1, %s1385_s13  ;;  %s124_s23 = int_to_ptr.vmem [resolvable:$true] %s123_s23 }
  0x12   : > { %s1806_s21 = scalar_select %p1469_p8, 1, 0 }
  0x13   : > { %p1141_p9 = pneg %p1469_p8  ;;  %s1245_s28 = scalar_lea.hbm %s1796_s1, 6144 }
  0x14   : > { %p1246_p11 = scmp.ne.s32.totalorder %s1796_s1, %s1245_s28  ;;  %p1252_p3 = scmp.lt.u32.totalorder %s1245_s28, %s1796_s1 }
  0x15   : > { %p1477_p10 = pnand %p1141_p9, %p1449_p1 }
  0x17   : > { %p1247_p12 = pneg %p1477_p10 }
  0x19   : > { %p1248_p13 = pnand %p1247_p12, %p1246_p11 }
  0x1b   : > { %p1249_p0 = pneg %p1248_p13 }
  0x1d   : > { %p1254_p5 = pnand %p1252_p3, %p1249_p0 }
  0x1f   : > { %1257 = shalt.err (!%p1254_p5)
}
  0x20   : > { %s1258_s5 = scalar_lea.vmem %s124_s23, 6144  ;;  %p1266_p1 = scmp.lt.s32.totalorder %s124_s23, %s124_s23 }
  0x21   : > { %p1259_p7 = scmp.ne.s32.totalorder %s124_s23, %s1258_s5  ;;  %p1267_p4 = scmp.lt.s32.totalorder %s1258_s5, %s1258_s5 }
  0x23   : > { %p1261_p9 = pnand %p1259_p7, %p1247_p12  ;;  %p1268_p8 = por %p1267_p4, %p1266_p1 }
  0x25   : > { %p1262_p6 = pneg %p1261_p9 }
  0x27   : > { %p1269_p2 = pnand %p1268_p8, %p1262_p6 }
  0x29   : > { %1272 = shalt.err (!%p1269_p2)
}
  0x2a   : > { %s1392_s6 = smov 128   ;;  %s1393_s7 = smov 8  }
  0x2b   : > { %1144 = dma.hbm_to_vmem [thread:$0]  (!%p1477_p10), %s1796_s1, 6144, %s124_s23, [#allocation6], %s1392_s6, %s1392_s6, %s1393_s7  }
  0x2c   : > { %p33_p1 = scmp.ge.s32.totalorder %s31_s25, 3  ;;  %s40_s16 = sadd.s32 1, %s1377_s11 }
  0x2d   : > { %p47_p2 = scmp.ne.s32.totalorder %s1377_s11, %s1373_s10  ;;  %p48_p4 = scmp.eq.s32.totalorder %s1389_s14, 0 }
  0x2e   : > { %s1821_s25 = smov (%p33_p1, %s31_s25), 0  ;;  %p1808_p8 = scmp.ne.s32.totalorder %s1803_s18, 0 }
  0x2f   : > { %p49_p6 = por %p48_p4, %p47_p2  ;;  %s35_s26 = ssub.s32 %s1385_s13, %s1821_s25 }
  0x30   : > { %p1506_p11 = por %p1808_p8, %p47_p2  ;;  %p1154_p12 = scmp.lt.s32.totalorder %s1389_s14, 3 }
  0x31   : > { %p38_p13 = scmp.eq.s32.totalorder %s35_s26, 0  ;;  %s137_s24 = sand.u32 1, %s1377_s11  }
  0x32   : > { %s1130_s27 = smul.u32 384, %s137_s24  ;;  %p1518_p10 = pnand %p1154_p12, %p49_p6 }
  0x33   : > { %s1515_s28 = scalar_select %p38_p13, %s1377_s11, %s40_s16  }
  0x34   : > { %s1131_s23 = smul.u32 6144, %s1385_s13  ;;  %s141_s29 = scalar_lea.vmem [#allocation2], %s1130_s27 }
  0x35   : > { %s151_s30 = sshll.u32 %s141_s29, 4  ;;  %s1529_s6 = scalar_lea.sflag [#allocation3], %s137_s24  ;;  %s1527_s30 = int_to_ptr.vmem [resolvable:$true] %s151_s30 }
  0x36   : > { %s1525_s5 = scalar_lea.hbm %s1795_s0, %s1131_s23  ;;  %p1275_p3 = pneg %p1518_p10 }
  0x37   : > { %s1273_s7 = scalar_lea.hbm %s1525_s5, 6144  ;;  %s1278_s16 = scalar_lea.hbm %s1795_s0, 18432 }
  0x38   : > { %p1274_p0 = scmp.ne.s32.totalorder %s1525_s5, %s1273_s7  ;;  %p1279_p9 = scmp.lt.u32.totalorder %s1525_s5, %s1795_s0 }
  0x39   : > { %p1280_p1 = scmp.lt.u32.totalorder %s1278_s16, %s1273_s7  ;;  %p1282_p4 = scmp.lt.u32.totalorder %s1273_s7, %s1525_s5 }
  0x3a   : > { %p1276_p5 = pnand %p1275_p3, %p1274_p0 }
  0x3b   : > { %p1281_p2 = por %p1280_p1, %p1279_p9 }
  0x3c   : > { %p1277_p7 = pneg %p1276_p5 }
  0x3d   : > { %p1283_p6 = por %p1282_p4, %p1281_p2 }
  0x3f   : > { %p1284_p8 = pnand %p1283_p6, %p1277_p7 }
  0x41   : > { %1287 = shalt.err (!%p1284_p8)
}
  0x42   : > { %s1288_s24 = scalar_lea.vmem %s1527_s30, 6144  ;;  %s1394_s23 = smov [#allocation2]  }
  0x43   : > { %p1289_p12 = scmp.ne.s32.totalorder %s1527_s30, %s1288_s24  ;;  %s1293_s29 = sshll.u32 %s1394_s23, 4  ;;  %s1294_s29 = int_to_ptr.vmem [resolvable:$false] %s1293_s29 }
  0x44   : > { %s1295_s4 = scalar_lea.vmem %s1294_s29, 12288  ;;  %p1296_p5 = scmp.lt.s32.totalorder %s1527_s30, %s1294_s29 }
  0x45   : > { %p1291_p13 = pnand %p1289_p12, %p1275_p3  ;;  %p1297_p9 = scmp.lt.s32.totalorder %s1295_s4, %s1288_s24 }
  0x47   : > { %p1292_p0 = pneg %p1291_p13  ;;  %p1298_p1 = por %p1297_p9, %p1296_p5 }
  0x49   : > { %p1299_p2 = pnand %p1298_p1, %p1292_p0 }
  0x4b   : > { %1302 = shalt.err (!%p1299_p2)
}
  0x4c   : > { %s1395_s18 = smov 384   ;;  %s1396_s7 = smov 24  }
  0x4d   : > { %1148 = dma.hbm_to_vmem [thread:$0]  (!%p1518_p10), %s1525_s5, 6144, %s1527_s30, %s1529_s6, %s1395_s18, %s1395_s18, %s1396_s7  }
  0x4e   : > { %p1811_p3 = scmp.ne.s32.totalorder %s1806_s21, 0 }
  0x4f   : > { %s1560_s8 = sand.u32 (!%p1811_p3), 1, %s1373_s10   ;;  %p1812_p7 = scmp.ne.s32.totalorder (!%p1811_p3), %s1804_s19, 0 }
  0x50   : > { %163 = sbr.rel (%p1811_p3) target bundleno = 574 (0x23e), region = 28  ;;  %s166_s16 = scalar_lea.sflag (!%p1811_p3), [#allocation3], %s1560_s8 }
  0x51   : > { %s1132_s15 = smul.u32 (!%p1811_p3), 384, %s1560_s8 }
  0x53   : > { %s1564_s26 = scalar_lea.vmem (!%p1811_p3), [#allocation2], %s1132_s15 }
  0x57   : > { %1356 = dma.done.wait (%p1812_p7), %s166_s16, 6144  }
  0x58   : > { %1358 = vsyncadd (%p1812_p7), %s166_s16, 4294961152  ;;  %p1813_p10 = scmp.ne.s32.totalorder %s1802_s17, 0 }
  0x5a   : > { %1360 = dma.done.wait (%p1813_p10), [#allocation6], 6144  }
  0x5b   : > { %1362 = vsyncadd (%p1813_p10), [#allocation6], 4294961152  ;;  %v235_v0 = vld [vmem:[#allocation5 + $0x80] sm:$0xff]  ;;  %v236_v1 = vld [vmem:[#allocation5 + $0x88] sm:$0xff]  ;;  %s891_s17 = sshll.u32 %s1560_s8, 7  ;;  %s897_s21 = sshll.u32 %s1381_s12, 11 }
  0x5c   : > { %v219_v2 = vld [vmem:[#allocation5] sm:$0xff]  ;;  %v1066_v3 = vpack.c.bf16 %v236_v1, %v235_v0  ;;  %v220_v4 = vld [vmem:[#allocation5 + $0x8] sm:$0xff]  ;;  %v237_v9 = vld [vmem:[#allocation5 + $0x90] sm:$0xff]  ;;  %s1707_s19 = scalar_lea.vmem [#allocation7], %s891_s17  ;;  %s1743_s6 = scalar_lea.hbm %s1797_s2, %s897_s21 }
  0x5d   : > { %v251_v5 = vld [vmem:[#allocation5 + $0x100] sm:$0xff]  ;;  %v252_v6 = vld [vmem:[#allocation5 + $0x108] sm:$0xff]  ;;  %v1068_v7 = vpack.c.bf16 %v220_v4, %v219_v2  ;;  %v238_v10 = vld [vmem:[#allocation5 + $0x98] sm:$0xff]  ;;  %s785_s30 = sshll.u32 %s1707_s19, 4  ;;  %s772_s27 = scalar_lea.sflag [#allocation4], %s1560_s8  ;;  %s1745_s30 = int_to_ptr.vmem [resolvable:$true] %s785_s30 }
  0x5e   : > { %v1098_v8 = vpack.c.bf16 %v252_v6, %v251_v5  ;;  %v221_v11 = vld [vmem:[#allocation5 + $0x10] sm:$0xff]  ;;  %1067 = vmatprep.subr.bf16.mxu0 %v1066_v3  ;;  %v1070_v12 = vpack.c.bf16 %v238_v10, %v237_v9  ;;  %v222_v13 = vld [vmem:[#allocation5 + $0x18] sm:$0xff]  ;;  %v239_v18 = vld [vmem:[#allocation5 + $0xa0] sm:$0xff]  ;;  %s1303_s24 = scalar_lea.vmem %s1745_s30, 2048  ;;  %s1397_s12 = smov [#allocation7]  }
  0x5f   : > { %v253_v14 = vld [vmem:[#allocation5 + $0x110] sm:$0xff]  ;;  %v254_v15 = vld [vmem:[#allocation5 + $0x118] sm:$0xff]  ;;  %1069 = vmatpush3.bf16.msra.mxu0 %v1068_v7  ;;  %v1072_v16 = vpack.c.bf16 %v222_v13, %v221_v11  ;;  %v240_v19 = vld [vmem:[#allocation5 + $0xa8] sm:$0xff]  ;;  %p1304_p4 = scmp.ne.s32.totalorder %s1745_s30, %s1303_s24  ;;  %s1307_s23 = sshll.u32 %s1397_s12, 4  ;;  %s1308_s23 = int_to_ptr.vmem [resolvable:$false] %s1307_s23 }
  0x60   : > { %1099 = vmatprep.subr.bf16.mxu1 %v1098_v8  ;;  %v1102_v17 = vpack.c.bf16 %v254_v15, %v253_v14  ;;  %v223_v20 = vld [vmem:[#allocation5 + $0x20] sm:$0xff]  ;;  %1071 = vmatprep.subr.bf16.mxu0 %v1070_v12  ;;  %v1074_v21 = vpack.c.bf16 %v240_v19, %v239_v18  ;;  %v224_v22 = vld [vmem:[#allocation5 + $0x28] sm:$0xff]  ;;  %v241_v26 = vld [vmem:[#allocation5 + $0xb0] sm:$0xff]  ;;  %s1309_s29 = scalar_lea.vmem %s1308_s23, 4096  ;;  %p1310_p12 = scmp.lt.s32.totalorder %s1745_s30, %s1308_s23 }
  0x61   : > { %1101 = vmatpush3.bf16.msra.mxu1 %v1098_v8  ;;  %v255_v23 = vld [vmem:[#allocation5 + $0x120] sm:$0xff]  ;;  %v256_v24 = vld [vmem:[#allocation5 + $0x128] sm:$0xff]  ;;  %v242_v27 = vld [vmem:[#allocation5 + $0xb8] sm:$0xff]  ;;  %v1076_v30 = vpack.c.bf16 %v224_v22, %v223_v20  ;;  %p1305_p6 = pnand %p1304_p4, %p1506_p11  ;;  %p1311_p13 = scmp.lt.s32.totalorder %s1309_s29, %s1303_s24 }
  0x62   : > { %1103 = vmatprep.subr.bf16.mxu1 %v1102_v17  ;;  %v1106_v25 = vpack.c.bf16 %v256_v24, %v255_v23  ;;  %v257_v28 = vld [vmem:[#allocation5 + $0x130] sm:$0xff]  ;;  %v258_v29 = vld [vmem:[#allocation5 + $0x138] sm:$0xff]  ;;  %v1078_v31 = vpack.c.bf16 %v242_v27, %v241_v26  ;;  %v243_v35 = vld [vmem:[#allocation5 + $0xc0] sm:$0xff] }
  0x63   : > { %1073 = vmatpush3.bf16.msra.mxu0 %v1072_v16  ;;  %v225_v32 = vld [vmem:[#allocation5 + $0x30] sm:$0xff]  ;;  %v226_v33 = vld [vmem:[#allocation5 + $0x38] sm:$0xff]  ;;  %v1110_v34 = vpack.c.bf16 %v258_v29, %v257_v28  ;;  %v244_v36 = vld [vmem:[#allocation5 + $0xc8] sm:$0xff]  ;;  %p1306_p8 = pneg %p1305_p6  ;;  %p1312_p0 = por %p1311_p13, %p1310_p12 }
  0x64   : > { %1075 = vmatprep.subr.bf16.mxu0 %v1074_v21  ;;  %v259_v37 = vld [vmem:[#allocation5 + $0x140] sm:$0xff]  ;;  %v260_v38 = vld [vmem:[#allocation5 + $0x148] sm:$0xff]  ;;  %v1080_v39 = vpack.c.bf16 %v226_v33, %v225_v32  ;;  %v1082_v40 = vpack.c.bf16 %v244_v36, %v243_v35  ;;  %v245_v44 = vld [vmem:[#allocation5 + $0xd0] sm:$0xff] }
  0x65   : > { %1105 = vmatpush3.bf16.msra.mxu1 %v1102_v17  ;;  %v227_v41 = vld [vmem:[#allocation5 + $0x40] sm:$0xff]  ;;  %v228_v42 = vld [vmem:[#allocation5 + $0x48] sm:$0xff]  ;;  %v1114_v43 = vpack.c.bf16 %v260_v38, %v259_v37  ;;  %v246_v45 = vld [vmem:[#allocation5 + $0xd8] sm:$0xff]  ;;  %p1313_p5 = pnand %p1312_p0, %p1306_p8 }
  0x66   : > { %1107 = vmatprep.subr.bf16.mxu1 %v1106_v25  ;;  %v261_v46 = vld [vmem:[#allocation5 + $0x150] sm:$0xff]  ;;  %v262_v47 = vld [vmem:[#allocation5 + $0x158] sm:$0xff]  ;;  %v1084_v48 = vpack.c.bf16 %v228_v42, %v227_v41  ;;  %v284_v49 = vld [vmem:[%s1564_s26 + $0x8] sm:$0xff]  ;;  %v1086_v51 = vpack.c.bf16 %v246_v45, %v245_v44 }
  0x67   : > { %1077 = vmatpush3.bf16.msra.mxu0 %v1076_v30  ;;  %v285_v50 = vld [vmem:[%s1564_s26 + $0x10] sm:$0xff]  ;;  %v230_v53 = vld [vmem:[#allocation5 + $0x58] sm:$0xff]  ;;  %v1118_v54 = vpack.c.bf16 %v262_v47, %v261_v46  ;;  %v247_v55 = vld [vmem:[#allocation5 + $0xe0] sm:$0xff]  ;;  %395 = vmatprep.mubr.f32.mxu0 %v284_v49 }
  0x68   : > { %1079 = vmatprep.subr.bf16.mxu0 %v1078_v31  ;;  %v229_v52 = vld [vmem:[#allocation5 + $0x50] sm:$0xff]  ;;  %v248_v56 = vld [vmem:[#allocation5 + $0xe8] sm:$0xff]  ;;  %v263_v57 = vld [vmem:[#allocation5 + $0x160] sm:$0xff]  ;;  %1042 = vmatprep.mubr.f32.mxu1 %v285_v50 }
  0x69   : > { %1109 = vmatpush3.bf16.msra.mxu1 %v1106_v25  ;;  %v264_v58 = vld [vmem:[#allocation5 + $0x168] sm:$0xff]  ;;  %v1088_v59 = vpack.c.bf16 %v230_v53, %v229_v52  ;;  %v1090_v60 = vpack.c.bf16 %v248_v56, %v247_v55  ;;  %v231_v61 = vld [vmem:[#allocation5 + $0x60] sm:$0xff]  ;;  %v249_v0 = vld [vmem:[#allocation5 + $0xf0] sm:$0xff]  ;;  %v672_v56 = vlaneseq }
  0x6a   : > { %1111 = vmatprep.subr.bf16.mxu1 %v1110_v34  ;;  %v232_v62 = vld [vmem:[#allocation5 + $0x68] sm:$0xff]  ;;  %v1122_v63 = vpack.c.bf16 %v264_v58, %v263_v57  ;;  %v250_v1 = vld [vmem:[#allocation5 + $0xf8] sm:$0xff]  ;;  %v265_v2 = vld [vmem:[#allocation5 + $0x170] sm:$0xff] }
  0x6b   : > { %1081 = vmatpush3.bf16.msra.mxu0 %v1080_v39  ;;  %v266_v3 = vld [vmem:[#allocation5 + $0x178] sm:$0xff]  ;;  %v1092_v4 = vpack.c.bf16 %v232_v62, %v231_v61  ;;  %v1094_v5 = vpack.c.bf16 %v250_v1, %v249_v0  ;;  %v233_v6 = vld [vmem:[#allocation5 + $0x70] sm:$0xff]  ;;  %v283_v10 = vld [vmem:[%s1564_s26] sm:$0xff] }
  0x6c   : > { %1083 = vmatprep.subr.bf16.mxu0 %v1082_v40  ;;  %v234_v7 = vld [vmem:[#allocation5 + $0x78] sm:$0xff]  ;;  %v1126_v8 = vpack.c.bf16 %v266_v3, %v265_v2  ;;  %v288_v11 = vld [vmem:[%s1564_s26 + $0x28] sm:$0xff]  ;;  %v287_v12 = vld [vmem:[%s1564_s26 + $0x20] sm:$0xff] }
  0x6d   : > { %1113 = vmatpush3.bf16.msra.mxu1 %v1110_v34  ;;  %v1096_v9 = vpack.c.bf16 %v234_v7, %v233_v6  ;;  %v291_v13 = vld [vmem:[%s1564_s26 + $0x40] sm:$0xff]  ;;  %v286_v14 = vld [vmem:[%s1564_s26 + $0x18] sm:$0xff]  ;;  %v297_v17 = vld [vmem:[%s1564_s26 + $0x70] sm:$0xff] }
  0x6e   : > { %1115 = vmatprep.subr.bf16.mxu1 %v1114_v43  ;;  %v290_v15 = vld [vmem:[%s1564_s26 + $0x38] sm:$0xff]  ;;  %v289_v18 = vld [vmem:[%s1564_s26 + $0x30] sm:$0xff]  ;;  %v300_v20 = vld [vmem:[%s1564_s26 + $0x88] sm:$0xff] }
  0x6f   : > { %1085 = vmatpush3.bf16.msra.mxu0 %v1084_v48  ;;  %v294_v16 = vld [vmem:[%s1564_s26 + $0x58] sm:$0xff]  ;;  %v293_v19 = vld [vmem:[%s1564_s26 + $0x50] sm:$0xff]  ;;  %v303_v21 = vld [vmem:[%s1564_s26 + $0xa0] sm:$0xff] }
  0x70   : > { %1087 = vmatprep.subr.bf16.mxu0 %v1086_v51  ;;  %v292_v22 = vld [vmem:[%s1564_s26 + $0x48] sm:$0xff]  ;;  %v306_v24 = vld [vmem:[%s1564_s26 + $0xb8] sm:$0xff]  ;;  %v309_v25 = vld [vmem:[%s1564_s26 + $0xd0] sm:$0xff] }
  0x71   : > { %1117 = vmatpush3.bf16.msra.mxu1 %v1114_v43  ;;  %v296_v23 = vld [vmem:[%s1564_s26 + $0x68] sm:$0xff]  ;;  %v295_v26 = vld [vmem:[%s1564_s26 + $0x60] sm:$0xff]  ;;  %v298_v30 = vld [vmem:[%s1564_s26 + $0x78] sm:$0xff] }
  0x72   : > { %1119 = vmatprep.subr.bf16.mxu1 %v1118_v54  ;;  %v299_v27 = vld [vmem:[%s1564_s26 + $0x80] sm:$0xff]  ;;  %v312_v28 = vld [vmem:[%s1564_s26 + $0xe8] sm:$0xff]  ;;  %v302_v31 = vld [vmem:[%s1564_s26 + $0x98] sm:$0xff] }
  0x73   : > { %1089 = vmatpush3.bf16.msra.mxu0 %v1088_v59  ;;  %v315_v29 = vld [vmem:[%s1564_s26 + $0x100] sm:$0xff]  ;;  %v318_v32 = vld [vmem:[%s1564_s26 + $0x118] sm:$0xff]  ;;  %v321_v33 = vld [vmem:[%s1564_s26 + $0x130] sm:$0xff] }
  0x74   : > { %1091 = vmatprep.subr.bf16.mxu0 %v1090_v60  ;;  %v301_v34 = vld [vmem:[%s1564_s26 + $0x90] sm:$0xff]  ;;  %v324_v36 = vld [vmem:[%s1564_s26 + $0x148] sm:$0xff]  ;;  %v327_v37 = vld [vmem:[%s1564_s26 + $0x160] sm:$0xff]  ;;  %v1622_v60 = vand.u32 127, %v672_v56 }
  0x75   : > { %1121 = vmatpush3.bf16.msra.mxu1 %v1118_v54  ;;  %v305_v35 = vld [vmem:[%s1564_s26 + $0xb0] sm:$0xff]  ;;  %v304_v38 = vld [vmem:[%s1564_s26 + $0xa8] sm:$0xff]  ;;  %v330_v40 = vld [vmem:[%s1564_s26 + $0x178] sm:$0xff] }
  0x76   : > { %1123 = vmatprep.subr.bf16.mxu1 %v1122_v63  ;;  %v308_v39 = vld [vmem:[%s1564_s26 + $0xc8] sm:$0xff]  ;;  %v307_v41 = vld [vmem:[%s1564_s26 + $0xc0] sm:$0xff]  ;;  %v310_v43 = vld [vmem:[%s1564_s26 + $0xd8] sm:$0xff]  ;;  %vm674_vm0 = vcmp.eq.s32.totalorder %v1622_v60, 16 }
  0x77   : > { %1093 = vmatpush3.bf16.msra.mxu0 %v1092_v4  ;;  %v311_v42 = vld [vmem:[%s1564_s26 + $0xe0] sm:$0xff]  ;;  %v314_v44 = vld [vmem:[%s1564_s26 + $0xf8] sm:$0xff]  ;;  %v313_v45 = vld [vmem:[%s1564_s26 + $0xf0] sm:$0xff] }
  0x78   : > { %1095 = vmatprep.subr.bf16.mxu0 %v1094_v5  ;;  %v317_v46 = vld [vmem:[%s1564_s26 + $0x110] sm:$0xff]  ;;  %v316_v47 = vld [vmem:[%s1564_s26 + $0x108] sm:$0xff]  ;;  %v319_v49 = vld [vmem:[%s1564_s26 + $0x120] sm:$0xff] }
  0x79   : > { %1125 = vmatpush3.bf16.msra.mxu1 %v1122_v63  ;;  %v320_v48 = vld [vmem:[%s1564_s26 + $0x128] sm:$0xff]  ;;  %v323_v50 = vld [vmem:[%s1564_s26 + $0x140] sm:$0xff]  ;;  %v322_v51 = vld [vmem:[%s1564_s26 + $0x138] sm:$0xff] }
  0x7a   : > { %1127 = vmatprep.subr.bf16.mxu1 %v1126_v8  ;;  %v326_v52 = vld [vmem:[%s1564_s26 + $0x158] sm:$0xff]  ;;  %v325_v53 = vld [vmem:[%s1564_s26 + $0x150] sm:$0xff]  ;;  %v328_v55 = vld [vmem:[%s1564_s26 + $0x168] sm:$0xff] }
  0x7b   : > { %1097 = vmatpush3.bf16.msra.mxu0 %v1096_v9  ;;  %v329_v54 = vld [vmem:[%s1564_s26 + $0x170] sm:$0xff] }
  0x7d   : > { %1129 = vmatpush3.bf16.msra.mxu1 %v1126_v8 }
  0x7e   : > { %396 = vmatmul.mubr.f32.vlgmr.msra.gmra.mrb[0].mxu0 %v283_v10 }
  0x7f   : > { %400 = vmatprep.mubr.f32.mxu0 %v287_v12 }
  0x80   : > { %1043 = vmatmul.mubr.f32.vlgmr.msra.gmra.mrb[0].mxu1 %v288_v11 }
  0x81   : > { %1045 = vmatprep.mubr.f32.mxu1 %v291_v13 }
  0x82   : > { %401 = vmatmul.mubr.f32.gmra.mrb[2].mxu0 %v286_v14 }
  0x83   : > { %405 = vmatprep.mubr.f32.mxu0 %v290_v15 }
  0x84   : > { %1046 = vmatmul.mubr.f32.gmra.mrb[2].mxu1 %v294_v16 }
  0x85   : > { %1048 = vmatprep.mubr.f32.mxu1 %v297_v17 }
  0x86   : > { %406 = vmatmul.mubr.f32.gmra.mrb[4].mxu0 %v289_v18 }
  0x87   : > { %410 = vmatprep.mubr.f32.mxu0 %v293_v19 }
  0x88   : > { %1049 = vmatmul.mubr.f32.gmra.mrb[4].mxu1 %v300_v20 }
  0x89   : > { %1051 = vmatprep.mubr.f32.mxu1 %v303_v21 }
  0x8a   : > { %411 = vmatmul.mubr.f32.gmra.mrb[6].mxu0 %v292_v22 }
  0x8b   : > { %415 = vmatprep.mubr.f32.mxu0 %v296_v23 }
  0x8c   : > { %1052 = vmatmul.mubr.f32.gmra.mrb[6].mxu1 %v306_v24 }
  0x8d   : > { %1054 = vmatprep.mubr.f32.mxu1 %v309_v25 }
  0x8e   : > { %416 = vmatmul.mubr.f32.gmra.mrb[8].mxu0 %v295_v26 }
  0x8f   : > { %420 = vmatprep.mubr.f32.mxu0 %v299_v27 }
  0x90   : > { %1055 = vmatmul.mubr.f32.gmra.mrb[8].mxu1 %v312_v28 }
  0x91   : > { %1057 = vmatprep.mubr.f32.mxu1 %v315_v29 }
  0x92   : > { %421 = vmatmul.mubr.f32.gmra.mrb[10].mxu0 %v298_v30 }
  0x93   : > { %425 = vmatprep.mubr.f32.mxu0 %v302_v31 }
  0x94   : > { %1058 = vmatmul.mubr.f32.gmra.mrb[10].mxu1 %v318_v32 }
  0x95   : > { %1060 = vmatprep.mubr.f32.mxu1 %v321_v33 }
  0x96   : > { %426 = vmatmul.mubr.f32.gmra.mrb[12].mxu0 %v301_v34 }
  0x97   : > { %430 = vmatprep.mubr.f32.mxu0 %v305_v35 }
  0x98   : > { %1061 = vmatmul.mubr.f32.gmra.mrb[12].mxu1 %v324_v36 }
  0x99   : > { %1063 = vmatprep.mubr.f32.mxu1 %v327_v37 }
  0x9a   : > { %431 = vmatmul.mubr.f32.gmra.mrb[14].mxu0 %v304_v38 }
  0x9b   : > { %435 = vmatprep.mubr.f32.mxu0 %v308_v39 }
  0x9c   : > { %1064 = vmatmul.mubr.f32.gmra.mrb[14].mxu1 %v330_v40 }
  0x9e   : > { %436 = vmatmul.mubr.f32.gmra.mrb[16].mxu0 %v307_v41 }
  0x9f   : > { %440 = vmatprep.mubr.f32.mxu0 %v311_v42 }
  0xa2   : > { %441 = vmatmul.mubr.f32.gmra.mrb[18].mxu0 %v310_v43 }
  0xa3   : > { %445 = vmatprep.mubr.f32.mxu0 %v314_v44 }
  0xa6   : > { %446 = vmatmul.mubr.f32.gmra.mrb[20].mxu0 %v313_v45 }
  0xa7   : > { %450 = vmatprep.mubr.f32.mxu0 %v317_v46 }
  0xaa   : > { %451 = vmatmul.mubr.f32.gmra.mrb[22].mxu0 %v316_v47 }
  0xab   : > { %455 = vmatprep.mubr.f32.mxu0 %v320_v48 }
  0xae   : > { %456 = vmatmul.mubr.f32.gmra.mrb[24].mxu0 %v319_v49 }
  0xaf   : > { %460 = vmatprep.mubr.f32.mxu0 %v323_v50 }
  0xb2   : > { %461 = vmatmul.mubr.f32.gmra.mrb[26].mxu0 %v322_v51 }
  0xb3   : > { %465 = vmatprep.mubr.f32.mxu0 %v326_v52 }
  0xb6   : > { %466 = vmatmul.mubr.f32.gmra.mrb[28].mxu0 %v325_v53 }
  0xb7   : > { %470 = vmatprep.mubr.f32.mxu0 %v329_v54 }
  0xba   : > { %471 = vmatmul.mubr.f32.gmra.mrb[30].mxu0 %v328_v55 }
 0x151   : > { %v930_v57 = vpop.f32.mrb[0].mxu0 }
 0x152   : > { %v931_v58 = vpop.f32.mrb[1].mxu0 }
 0x153   : > { %v1044_v59 = vpop.f32.mrb[0].mxu1  ;;  %v932_v61 = vadd.f32 %v931_v58, %v930_v57 }
 0x154   : > { %v542_v62 = vpop.f32.mrb[1].mxu1 }
 0x155   : > { %v1624_v63 = vadd.f32 %v932_v61, %v542_v62  ;;  %v933_v0 = vpop.f32.mrb[2].mxu0 }
 0x156   : > { %v934_v1 = vpop.f32.mrb[3].mxu0 }
 0x157   : > { %v1047_v2 = vpop.f32.mrb[2].mxu1  ;;  %v935_v3 = vadd.f32 %v934_v1, %v933_v0  ;;  %v675_v7 = vsel %vm674_vm0, %v1624_v63, 0.0 }
 0x158   : > { %v552_v4 = vpop.f32.mrb[3].mxu1  ;;  %691 = vadd.xlane.f32.xlu0 %v675_v7 }
 0x159   : > { %v1627_v5 = vadd.f32 %v1044_v59, %v935_v3  ;;  %v936_v6 = vpop.f32.mrb[4].mxu0 }
 0x15a   : > { %v937_v8 = vpop.f32.mrb[5].mxu0 }
 0x15b   : > { %v1050_v9 = vpop.f32.mrb[4].mxu1  ;;  %v938_v10 = vadd.f32 %v937_v8, %v936_v6  ;;  %v676_v14 = vsel %vm674_vm0, %v1627_v5, 0.0 }
 0x15c   : > { %v562_v11 = vpop.f32.mrb[5].mxu1  ;;  %693 = vadd.xlane.f32.xlu0 %v676_v14 }
 0x15d   : > { %v1632_v12 = vadd.f32 %v938_v10, %v552_v4  ;;  %v939_v13 = vpop.f32.mrb[6].mxu0 }
 0x15e   : > { %v940_v15 = vpop.f32.mrb[7].mxu0 }
 0x15f   : > { %v1053_v16 = vpop.f32.mrb[6].mxu1  ;;  %v941_v17 = vadd.f32 %v940_v15, %v939_v13  ;;  %v677_v21 = vsel %vm674_vm0, %v1632_v12, 0.0 }
 0x160   : > { %v572_v18 = vpop.f32.mrb[7].mxu1  ;;  %695 = vadd.xlane.f32.xlu1 %v677_v21 }
 0x161   : > { %v1637_v19 = vadd.f32 %v1047_v2, %v941_v17  ;;  %v942_v20 = vpop.f32.mrb[8].mxu0 }
 0x162   : > { %v943_v22 = vpop.f32.mrb[9].mxu0 }
 0x163   : > { %v1056_v23 = vpop.f32.mrb[8].mxu1  ;;  %v944_v24 = vadd.f32 %v943_v22, %v942_v20  ;;  %v678_v28 = vsel %vm674_vm0, %v1637_v19, 0.0 }
 0x164   : > { %v582_v25 = vpop.f32.mrb[9].mxu1  ;;  %697 = vadd.xlane.f32.xlu1 %v678_v28 }
 0x165   : > { %v1642_v26 = vadd.f32 %v944_v24, %v562_v11  ;;  %v945_v27 = vpop.f32.mrb[10].mxu0 }
 0x166   : > { %v946_v29 = vpop.f32.mrb[11].mxu0 }
 0x167   : > { %v1059_v30 = vpop.f32.mrb[10].mxu1  ;;  %v947_v31 = vadd.f32 %v946_v29, %v945_v27  ;;  %v679_v35 = vsel %vm674_vm0, %v1642_v26, 0.0 }
 0x168   : > { %v592_v32 = vpop.f32.mrb[11].mxu1  ;;  %699 = vadd.xlane.f32.xlu0 %v679_v35 }
 0x169   : > { %v1647_v33 = vadd.f32 %v1050_v9, %v947_v31  ;;  %v948_v34 = vpop.f32.mrb[12].mxu0 }
 0x16a   : > { %v949_v36 = vpop.f32.mrb[13].mxu0 }
 0x16b   : > { %v1062_v37 = vpop.f32.mrb[12].mxu1  ;;  %v950_v38 = vadd.f32 %v949_v36, %v948_v34  ;;  %v680_v42 = vsel %vm674_vm0, %v1647_v33, 0.0 }
 0x16c   : > { %v602_v39 = vpop.f32.mrb[13].mxu1  ;;  %701 = vadd.xlane.f32.xlu1 %v680_v42 }
 0x16d   : > { %v1652_v40 = vadd.f32 %v950_v38, %v572_v18  ;;  %v951_v41 = vpop.f32.mrb[14].mxu0 }
 0x16e   : > { %v952_v43 = vpop.f32.mrb[15].mxu0 }
 0x16f   : > { %v1065_v44 = vpop.f32.mrb[14].mxu1  ;;  %v953_v45 = vadd.f32 %v952_v43, %v951_v41  ;;  %v681_v49 = vsel %vm674_vm0, %v1652_v40, 0.0 }
 0x170   : > { %v612_v46 = vpop.f32.mrb[15].mxu1  ;;  %703 = vadd.xlane.f32.xlu0 %v681_v49 }
 0x171   : > { %v1657_v47 = vadd.f32 %v1053_v16, %v953_v45  ;;  %v954_v48 = vpop.f32.mrb[16].mxu0 }
 0x172   : > { %v955_v50 = vpop.f32.mrb[17].mxu0 }
 0x173   : > { %v956_v51 = vadd.f32 %v955_v50, %v954_v48  ;;  %v682_v54 = vsel %vm674_vm0, %v1657_v47, 0.0 }
 0x174   : > { %705 = vadd.xlane.f32.xlu1 %v682_v54 }
 0x175   : > { %v1662_v52 = vadd.f32 %v956_v51, %v582_v25  ;;  %v957_v53 = vpop.f32.mrb[18].mxu0 }
 0x176   : > { %v958_v55 = vpop.f32.mrb[19].mxu0 }
 0x177   : > { %v959_v56 = vadd.f32 %v958_v55, %v957_v53  ;;  %v683_v59 = vsel %vm674_vm0, %v1662_v52, 0.0 }
 0x178   : > { %707 = vadd.xlane.f32.xlu0 %v683_v59 }
 0x179   : > { %v1667_v57 = vadd.f32 %v1056_v23, %v959_v56  ;;  %v960_v58 = vpop.f32.mrb[20].mxu0 }
 0x17a   : > { %v961_v61 = vpop.f32.mrb[21].mxu0 }
 0x17b   : > { %v962_v62 = vadd.f32 %v961_v61, %v960_v58  ;;  %v684_v2 = vsel %vm674_vm0, %v1667_v57, 0.0 }
 0x17c   : > { %709 = vadd.xlane.f32.xlu1 %v684_v2 }
 0x17d   : > { %v1672_v0 = vadd.f32 %v962_v62, %v592_v32  ;;  %v963_v1 = vpop.f32.mrb[22].mxu0 }
 0x17e   : > { %v964_v3 = vpop.f32.mrb[23].mxu0 }
 0x17f   : > { %v965_v4 = vadd.f32 %v964_v3, %v963_v1  ;;  %v685_v8 = vsel %vm674_vm0, %v1672_v0, 0.0 }
 0x180   : > { %711 = vadd.xlane.f32.xlu0 %v685_v8 }
 0x181   : > { %v1677_v6 = vadd.f32 %v1059_v30, %v965_v4  ;;  %v966_v7 = vpop.f32.mrb[24].mxu0 }
 0x182   : > { %v967_v9 = vpop.f32.mrb[25].mxu0 }
 0x183   : > { %v968_v10 = vadd.f32 %v967_v9, %v966_v7  ;;  %v686_v14 = vsel %vm674_vm0, %v1677_v6, 0.0 }
 0x184   : > { %713 = vadd.xlane.f32.xlu1 %v686_v14 }
 0x185   : > { %v1682_v11 = vadd.f32 %v968_v10, %v602_v39  ;;  %v969_v13 = vpop.f32.mrb[26].mxu0 }
 0x186   : > { %v970_v15 = vpop.f32.mrb[27].mxu0 }
 0x187   : > { %v971_v16 = vadd.f32 %v970_v15, %v969_v13  ;;  %v687_v20 = vsel %vm674_vm0, %v1682_v11, 0.0 }
 0x188   : > { %715 = vadd.xlane.f32.xlu0 %v687_v20 }
 0x189   : > { %v1687_v17 = vadd.f32 %v1062_v37, %v971_v16  ;;  %v972_v18 = vpop.f32.mrb[28].mxu0 }
 0x18a   : > { %v973_v21 = vpop.f32.mrb[29].mxu0 }
 0x18b   : > { %v974_v22 = vadd.f32 %v973_v21, %v972_v18  ;;  %v688_v25 = vsel %vm674_vm0, %v1687_v17, 0.0 }
 0x18c   : > { %717 = vadd.xlane.f32.xlu1 %v688_v25 }
 0x18d   : > { %v1692_v23 = vadd.f32 %v974_v22, %v612_v46  ;;  %v975_v24 = vpop.f32.mrb[30].mxu0 }
 0x18e   : > { %v976_v27 = vpop.f32.mrb[31].mxu0 }
 0x18f   : > { %v977_v28 = vadd.f32 %v976_v27, %v975_v24  ;;  %v689_v30 = vsel %vm674_vm0, %v1692_v23, 0.0 }
 0x190   : > { %719 = vadd.xlane.f32.xlu0 %v689_v30 }
 0x191   : > { %v1697_v29 = vadd.f32 %v1065_v44, %v977_v28 }
 0x193   : > { %v690_v31 = vsel %vm674_vm0, %v1697_v29, 0.0 }
 0x194   : > { %721 = vadd.xlane.f32.xlu1 %v690_v31 }
 0x1e5   : > { %v692_v32 = vpop.xlane.xlu0 %691 }
 0x1e6   : > { %1213 = vrcp.f32 %v692_v32 }
 0x1e9   : > { %v694_v34 = vpop.xlane.xlu0 %693 }
 0x1ea   : > { %1215 = vrcp.f32 %v694_v34 }
 0x1ed   : > { %v696_v35 = vpop.xlane.xlu1 %695 }
 0x1ee   : > { %1217 = vrcp.f32 %v696_v35 }
 0x1f0   : > { %v1214_v36 = vpop.eup %1213 }
 0x1f1   : > { %v739_v37 = vmul.f32 %v1214_v36, %v1624_v63  ;;  %v698_v38 = vpop.xlane.xlu1 %697 }
 0x1f2   : > { %1219 = vrcp.f32 %v698_v38 }
 0x1f3   : > { %755 = vst [vmem:[%s1707_s19] sm:$0xff] %v739_v37 }
 0x1f4   : > { %v1216_v60 = vpop.eup %1215 }
 0x1f5   : > { %v740_v39 = vmul.f32 %v1216_v60, %v1627_v5  ;;  %v700_v41 = vpop.xlane.xlu0 %699 }
 0x1f6   : > { %1221 = vrcp.f32 %v700_v41 }
 0x1f7   : > { %756 = vst [vmem:[%s1707_s19 + $0x8] sm:$0xff] %v740_v39 }
 0x1f8   : > { %v1218_v42 = vpop.eup %1217 }
 0x1f9   : > { %v741_v43 = vmul.f32 %v1218_v42, %v1632_v12  ;;  %v702_v63 = vpop.xlane.xlu1 %701 }
 0x1fa   : > { %1223 = vrcp.f32 %v702_v63 }
 0x1fb   : > { %757 = vst [vmem:[%s1707_s19 + $0x10] sm:$0xff] %v741_v43 }
 0x1fc   : > { %v1220_v44 = vpop.eup %1219 }
 0x1fd   : > { %v742_v45 = vmul.f32 %v1220_v44, %v1637_v19  ;;  %v704_v46 = vpop.xlane.xlu0 %703 }
 0x1fe   : > { %1225 = vrcp.f32 %v704_v46 }
 0x1ff   : > { %758 = vst [vmem:[%s1707_s19 + $0x18] sm:$0xff] %v742_v45 }
 0x200   : > { %v1222_v48 = vpop.eup %1221 }
 0x201   : > { %v743_v5 = vmul.f32 %v1222_v48, %v1642_v26  ;;  %v706_v49 = vpop.xlane.xlu1 %705 }
 0x202   : > { %1227 = vrcp.f32 %v706_v49 }
 0x203   : > { %759 = vst [vmem:[%s1707_s19 + $0x20] sm:$0xff] %v743_v5 }
 0x204   : > { %v1224_v50 = vpop.eup %1223 }
 0x205   : > { %v744_v12 = vmul.f32 %v1224_v50, %v1647_v33  ;;  %v708_v51 = vpop.xlane.xlu0 %707 }
 0x206   : > { %1229 = vrcp.f32 %v708_v51 }
 0x207   : > { %760 = vst [vmem:[%s1707_s19 + $0x28] sm:$0xff] %v744_v12 }
 0x208   : > { %v1226_v53 = vpop.eup %1225 }
 0x209   : > { %v745_v19 = vmul.f32 %v1226_v53, %v1652_v40  ;;  %v710_v54 = vpop.xlane.xlu1 %709 }
 0x20a   : > { %1231 = vrcp.f32 %v710_v54 }
 0x20b   : > { %761 = vst [vmem:[%s1707_s19 + $0x30] sm:$0xff] %v745_v19 }
 0x20c   : > { %v1228_v55 = vpop.eup %1227 }
 0x20d   : > { %v746_v26 = vmul.f32 %v1228_v55, %v1657_v47  ;;  %v712_v56 = vpop.xlane.xlu0 %711 }
 0x20e   : > { %1233 = vrcp.f32 %v712_v56 }
 0x20f   : > { %762 = vst [vmem:[%s1707_s19 + $0x38] sm:$0xff] %v746_v26 }
 0x210   : > { %v1230_v58 = vpop.eup %1229 }
 0x211   : > { %v747_v33 = vmul.f32 %v1230_v58, %v1662_v52  ;;  %v714_v59 = vpop.xlane.xlu1 %713 }
 0x212   : > { %1235 = vrcp.f32 %v714_v59 }
 0x213   : > { %763 = vst [vmem:[%s1707_s19 + $0x40] sm:$0xff] %v747_v33 }
 0x214   : > { %v1232_v61 = vpop.eup %1231 }
 0x215   : > { %v748_v40 = vmul.f32 %v1232_v61, %v1667_v57  ;;  %v716_v62 = vpop.xlane.xlu0 %715 }
 0x216   : > { %1237 = vrcp.f32 %v716_v62 }
 0x217   : > { %764 = vst [vmem:[%s1707_s19 + $0x48] sm:$0xff] %v748_v40 }
 0x218   : > { %v1234_v1 = vpop.eup %1233 }
 0x219   : > { %v749_v47 = vmul.f32 %v1234_v1, %v1672_v0  ;;  %v718_v2 = vpop.xlane.xlu1 %717 }
 0x21a   : > { %1239 = vrcp.f32 %v718_v2 }
 0x21b   : > { %765 = vst [vmem:[%s1707_s19 + $0x50] sm:$0xff] %v749_v47 }
 0x21c   : > { %v1236_v52 = vpop.eup %1235 }
 0x21d   : > { %v750_v3 = vmul.f32 %v1236_v52, %v1677_v6  ;;  %v720_v4 = vpop.xlane.xlu0 %719 }
 0x21e   : > { %1241 = vrcp.f32 %v720_v4 }
 0x21f   : > { %766 = vst [vmem:[%s1707_s19 + $0x58] sm:$0xff] %v750_v3 }
 0x220   : > { %v1238_v57 = vpop.eup %1237 }
 0x221   : > { %v751_v7 = vmul.f32 %v1238_v57, %v1682_v11  ;;  %v722_v8 = vpop.xlane.xlu1 %721 }
 0x222   : > { %1243 = vrcp.f32 %v722_v8 }
 0x223   : > { %767 = vst [vmem:[%s1707_s19 + $0x60] sm:$0xff] %v751_v7 }
 0x224   : > { %v1240_v0 = vpop.eup %1239 }
 0x225   : > { %v752_v9 = vmul.f32 %v1240_v0, %v1687_v17 }
 0x227   : > { %768 = vst [vmem:[%s1707_s19 + $0x68] sm:$0xff] %v752_v9 }
 0x228   : > { %v1242_v10 = vpop.eup %1241 }
 0x229   : > { %v753_v6 = vmul.f32 %v1242_v10, %v1692_v23 }
 0x22b   : > { %769 = vst [vmem:[%s1707_s19 + $0x70] sm:$0xff] %v753_v6 }
 0x22c   : > { %v1244_v13 = vpop.eup %1243 }
 0x22d   : > { %v754_v11 = vmul.f32 %v1244_v13, %v1697_v29 }
 0x22f   : > { %770 = vst [vmem:[%s1707_s19 + $0x78] sm:$0xff] %v754_v11 }
 0x230   : > { %1316 = shalt.err (!%p1313_p5)
}
 0x231   : > { %s1317_s4 = scalar_lea.hbm %s1743_s6, 2048  ;;  %s1321_s15 = scalar_lea.hbm %s1797_s2, 6144 }
 0x232   : > { %p1318_p9 = scmp.ne.s32.totalorder %s1743_s6, %s1317_s4  ;;  %p1322_p3 = scmp.lt.u32.totalorder %s1743_s6, %s1797_s2 }
 0x233   : > { %p1323_p7 = scmp.lt.u32.totalorder %s1321_s15, %s1317_s4  ;;  %p1325_p4 = scmp.lt.u32.totalorder %s1317_s4, %s1743_s6 }
 0x234   : > { %p1319_p1 = pnand %p1318_p9, %p1506_p11 }
 0x235   : > { %p1324_p10 = por %p1323_p7, %p1322_p3 }
 0x236   : > { %p1320_p2 = pneg %p1319_p1 }
 0x237   : > { %p1326_p6 = por %p1325_p4, %p1324_p10 }
 0x239   : > { %p1327_p8 = pnand %p1326_p6, %p1320_p2 }
 0x23b   : > { %1330 = shalt.err (!%p1327_p8)
}
 0x23c   : > { %s1398_s17 = smov 128   ;;  %s1399_s19 = smov 8  }
 0x23d   : > { %1139 = dma.vmem_to_hbm [thread:$0]  (%p1506_p11), %s1745_s30, 2048, %s1743_s6, %s772_s27, %s1398_s17, %s1398_s17, %s1399_s19  }
 0x23e PF: > { %p1156_p12 = scmp.ge.s32.totalorder %s1389_s14, 2  ;;  %s800_s21 = sand.u32 1, %s1369_s9  }
 0x23f   : > { %p1814_p13 = scmp.ne.s32.totalorder %s1805_s20, 0  ;;  %s801_s3 = scalar_lea.sflag [#allocation4], %s800_s21 }
 0x241   : > { %p1150_p0 = pnand %p1156_p12, %p1814_p13 }
 0x243   : > { %1364 = dma.done.wait (!%p1150_p0), %s801_s3, 2048  }
 0x244   : > { %1366 = vsyncadd (!%p1150_p0), %s801_s3, 4294965248  ;;  %s19_s14 = sadd.s32 1, %s1389_s14   ;;  %s1815_s9 = smov %s1373_s10 }
 0x245   : > { %p16_p5 = scmp.ge.s32.totalorder %s19_s14, 5   ;;  %s1816_s10 = smov %s1377_s11 }
 0x246   : > { %s1817_s11 = smov %s1515_s28  ;;  %s1818_s12 = smov %s1385_s13 }
 0x247   : > { %s1819_s13 = smov %s1821_s25  ;;  %18 = sbr.rel (!%p16_p5) target bundleno = 7 (0x7), region = 86 }
 0x24e   :  { %806 = vsyncpa [#allocation3], 1 }
 0x24f   :  { %808 = vsyncpa [#allocation3 + $0x1], 1 }
 0x250   :  { %809 = vsyncpa [#allocation6], 1 }
 0x251   :  { %810 = vsyncpa [#allocation4], 1 }
 0x252   :  { %812 = vsyncpa [#allocation4 + $0x1], 1 }

</bundles_post_ra>
